<compile_context>
chip_gen: v7x
topology: tpu7x:2x2x1
jax: 0.10.0
libtpu: 0.0.40
codegen_flags: <defaults>
</compile_context>

<pallas_src>
import functools
import math

import jax
import jax.numpy as jnp
from jax.experimental import pallas as pl
from jax.experimental.pallas import tpu as pltpu

_LANES = 128
_SUBLANES = 8
_CHUNK_ROWS = 512                   # 512 rows x 128 lanes x 4 B = 256 KiB per chunk
_MASK31 = 0x7FFFFFFF                # low-31-bit mask for the order-preserving key map
_INT_MIN = -(2 ** 31)
_INT_MAX = 2 ** 31 - 1


def _moments_kernel(state_ref, keys_ref, out_ref, *,
                    num_chunks, chunk_rows,
                    k_lo, frac_lo, k_hi, frac_hi, decay, min_val):
    """Exact 5%/95% order statistics (dual-rank binary search over pre-keyed
    int32 data) + EMA update, fully in-kernel.  All scans are chunked."""
    int_min = jnp.full((1, 1), _INT_MIN, jnp.int32)
    int_max = jnp.full((1, 1), _INT_MAX, jnp.int32)
    thresh_lo = jnp.int32(k_lo + 1)          # rank -> required count (exact int32)
    thresh_hi = jnp.int32(k_hi + 1)
    mask31 = jnp.int32(_MASK31)

    def chunked_scan(step, init):
        # Stream the keys block by block; carries are small (1,128) accumulators
        # so vreg live ranges stay bounded and resident VMEM stays ~= keys block.
        if num_chunks == 1:
            return step(keys_ref[...], init)

        def body(c, carry):
            start = pl.multiple_of(c * chunk_rows, 8)
            return step(keys_ref[pl.ds(start, chunk_rows), :], carry)

        return jax.lax.fori_loop(0, num_chunks, body, init, unroll=2)

    def lane_sum(v):                         # (1,128) -> (1,1), single XLU reduce
        return jnp.sum(v, axis=1, keepdims=True)

    def lane_min(v):
        return jnp.min(v, axis=1, keepdims=True)

    # ---- fused dual-rank binary search over the int32 key space (32 passes) ----
    # TODO(synk): tighten the initial [lo,hi] with a one-pass key min/max and a
    # lax.while_loop early-exit; on v7x split the two rank searches across the
    # two TensorCores via pl.core_map.
    def search_body(_, carry):
        lo_l, hi_l, lo_h, hi_h = carry
        # floor((lo+hi)/2) without int32 overflow
        mid_l = (lo_l >> 1) + (hi_l >> 1) + (lo_l & hi_l & 1)
        mid_h = (lo_h >> 1) + (hi_h >> 1) + (lo_h & hi_h & 1)

        def step(keys, c):
            acc_l, acc_h = c
            acc_l = acc_l + jnp.sum((keys <= mid_l).astype(jnp.int32),
                                    axis=0, keepdims=True)
            acc_h = acc_h + jnp.sum((keys <= mid_h).astype(jnp.int32),
                                    axis=0, keepdims=True)
            return acc_l, acc_h

        zero = jnp.zeros((1, _LANES), jnp.int32)
        acc_l, acc_h = chunked_scan(step, (zero, zero))
        c_l = lane_sum(acc_l)
        c_h = lane_sum(acc_h)
        take_l = c_l >= thresh_lo
        take_h = c_h >= thresh_hi
        lo_l = jnp.where(take_l, lo_l, mid_l + 1)
        hi_l = jnp.where(take_l, mid_l, hi_l)
        lo_h = jnp.where(take_h, lo_h, mid_h + 1)
        hi_h = jnp.where(take_h, mid_h, hi_h)
        return lo_l, hi_l, lo_h, hi_h

    _, key_lo, _, key_hi = jax.lax.fori_loop(
        0, 32, search_body, (int_min, int_max, int_min, int_max))

    def key_to_f32(kb):                      # the key map is an involution
        return pltpu.bitcast(kb ^ ((kb >> 31) & mask31), jnp.float32)

    v_lo0 = key_to_f32(key_lo)
    v_hi0 = key_to_f32(key_hi)

    need_kp1 = (frac_lo != 0.0) or (frac_hi != 0.0)
    if need_kp1:
        # One extra shared chunked pass: count(<= v_k) and the smallest key
        # strictly above v_k, for both quantiles.
        def step(keys, c):
            cl, ch, ml, mh = c
            cl = cl + jnp.sum((keys <= key_lo).astype(jnp.int32),
                              axis=0, keepdims=True)
            ch = ch + jnp.sum((keys <= key_hi).astype(jnp.int32),
                              axis=0, keepdims=True)
            ml = jnp.minimum(ml, jnp.min(
                jnp.where(keys > key_lo, keys, jnp.int32(_INT_MAX)),
                axis=0, keepdims=True))
            mh = jnp.minimum(mh, jnp.min(
                jnp.where(keys > key_hi, keys, jnp.int32(_INT_MAX)),
                axis=0, keepdims=True))
            return cl, ch, ml, mh

        zero = jnp.zeros((1, _LANES), jnp.int32)
        full = jnp.full((1, _LANES), _INT_MAX, jnp.int32)
        cl, ch, ml, mh = chunked_scan(step, (zero, zero, full, full))
        c_l = lane_sum(cl)
        c_h = lane_sum(ch)
        nxt_l = lane_min(ml)
        nxt_h = lane_min(mh)
        # >= k+2 elements <= v_k  =>  v_{k+1} == v_k (duplicates); otherwise the
        # smallest key above v_k (fall back to v_k if nothing is above it).
        key_lo1 = jnp.where(c_l >= thresh_lo + 1, key_lo,
                            jnp.where(nxt_l == int_max, key_lo, nxt_l))
        key_hi1 = jnp.where(c_h >= thresh_hi + 1, key_hi,
                            jnp.where(nxt_h == int_max, key_hi, nxt_h))
        v_lo1 = key_to_f32(key_lo1)
        v_hi1 = key_to_f32(key_hi1)
    else:
        v_lo1 = v_lo0
        v_hi1 = v_hi0

    # Linear interpolation (torch.quantile default); skipped statically if frac==0.
    q_low = v_lo0 + jnp.float32(frac_lo) * (v_lo1 - v_lo0) if frac_lo != 0.0 else v_lo0
    q_high = v_hi0 + jnp.float32(frac_hi) * (v_hi1 - v_hi0) if frac_hi != 0.0 else v_hi0

    old_low = state_ref[0]                   # scalars from SMEM
    old_high = state_ref[1]
    d = jnp.float32(decay)
    omd = jnp.float32(1.0 - decay)
    new_low = d * old_low + omd * q_low      # (1, 1)
    new_high = d * old_high + omd * q_high   # (1, 1)
    inv_scale = jnp.maximum(jnp.float32(min_val), new_high - new_low)

    # Single lane-dense output block: lane 0 = low, lane 1 = high, lane 2 = scale.
    lane = jax.lax.broadcasted_iota(jnp.int32, (1, _LANES), 1)
    out_ref[...] = jnp.where(lane == 0, new_low,
                             jnp.where(lane == 1, new_high, inv_scale))


def _vmem_capacity_bytes():
    """Per-core VMEM capacity; conservative fallback if the query is unavailable."""
    try:
        cap = int(pltpu.get_tpu_info().vmem_capacity_bytes)
        if cap > 0:
            return cap
    except Exception:
        pass
    return 64 << 20   # v7x per-core VMEM; safe lower bound for v5e/v6e too


def moments_forward(x, low, high, *, decay=0.99, min_=1.0,
                    percentile_low=0.05, percentile_high=0.95):
    """Functional Moments.forward: returns (new_low, new_high, inverse_scale).

    PyTorch's forward returns (low, inverse_scale); new_high is the carried
    buffer returned here so callers can thread the state functionally.
    """
    xf = jnp.asarray(x, jnp.float32).reshape(-1)
    n = int(xf.shape[0])
    if n == 0:
        raise ValueError("Moments requires a non-empty input.")

    # Row layout: pad flattened input to whole (8,128) vregs; when chunking,
    # pad further so the chunk count is even (chunk loop unrolled by 2).
    rows = -(-n // _LANES)
    rows = -(-rows // _SUBLANES) * _SUBLANES
    if rows <= 2 * _CHUNK_ROWS:
        chunk_rows, num_chunks = rows, 1
    else:
        chunk_rows = _CHUNK_ROWS
        rows = -(-rows // (2 * _CHUNK_ROWS)) * (2 * _CHUNK_ROWS)
        num_chunks = rows // _CHUNK_ROWS           # even by construction

    total = rows * _LANES
    x_bytes = total * 4

    # Generation-aware VMEM budget: resident keys block + a few MiB chunk scratch.
    vmem_cap = _vmem_capacity_bytes()              # 64 MiB v7x, 128 MiB v5e/v6e
    if x_bytes > vmem_cap - (24 << 20):
        # TODO(synk): gridded HBM-streaming histogram-select fallback for inputs
        # that exceed a single resident VMEM block.
        raise ValueError("input too large for the single-block VMEM Moments kernel")
    vmem_limit = int(min(vmem_cap - (4 << 20), max(32 << 20, x_bytes + (16 << 20))))

    # Order-preserving float->int32 key map + padding, done ONCE here (single
    # fused HBM pass); the kernel never needs x as float.  NOTE: NaN inputs
    # diverge from torch.quantile (torch propagates NaN); +/-inf order correctly.
    bits = jax.lax.bitcast_convert_type(xf, jnp.int32)
    keys = bits ^ ((bits >> 31) & jnp.int32(_MASK31))
    pad = total - n
    if pad:
        keys = jnp.concatenate(
            [keys, jnp.full((pad,), _INT_MAX, jnp.int32)])   # sorts above all real keys
    keys2d = keys.reshape(rows, _LANES)

    def rank(q):
        pos = q * (n - 1)
        k = int(math.floor(pos))
        return k, float(pos - k)

    k_lo, frac_lo = rank(float(percentile_low))
    k_hi, frac_hi = rank(float(percentile_high))

    state = jnp.stack([jnp.asarray(low, jnp.float32),
                       jnp.asarray(high, jnp.float32)]).astype(jnp.float32)

    kernel = functools.partial(
        _moments_kernel,
        num_chunks=num_chunks, chunk_rows=chunk_rows,
        k_lo=k_lo, frac_lo=frac_lo, k_hi=k_hi, frac_hi=frac_hi,
        decay=float(decay), min_val=float(min_))

    out = pl.pallas_call(
        kernel,
        out_shape=jax.ShapeDtypeStruct((1, _LANES), jnp.float32),
        in_specs=[pl.BlockSpec(memory_space=pltpu.MemorySpace.SMEM),
                  pl.BlockSpec(memory_space=pltpu.MemorySpace.VMEM)],
        out_specs=pl.BlockSpec(memory_space=pltpu.MemorySpace.VMEM),
        compiler_params=pltpu.CompilerParams(vmem_limit_bytes=vmem_limit),
    )(state, keys2d)

    return out[0, 0], out[0, 1], out[0, 2]


def _moments_reference(x, low, high, *, decay=0.99, min_=1.0,
                       percentile_low=0.05, percentile_high=0.95):
    xf = jnp.asarray(x, jnp.float32).reshape(-1)
    lo_q = jnp.quantile(xf, percentile_low)
    hi_q = jnp.quantile(xf, percentile_high)
    new_low = decay * low + (1.0 - decay) * lo_q
    new_high = decay * high + (1.0 - decay) * hi_q
    return new_low, new_high, jnp.maximum(jnp.float32(min_), new_high - new_low)


if __name__ == "__main__":
    key = jax.random.PRNGKey(0)
    x = jax.random.normal(key, (2, 4, 16, 16), dtype=jnp.float32)  # NCHW-style input
    low0 = jnp.float32(0.0)   # buffer 'low'  (registered as zeros)
    high0 = jnp.float32(0.0)  # buffer 'high' (registered as zeros)

    new_low, new_high, inv_scale = moments_forward(x, low0, high0)
    jax.block_until_ready((new_low, new_high, inv_scale))

    # forward() returns (low, inverse_scale); new_high is the carried buffer.
    ref_low, ref_high, ref_scale = _moments_reference(x, low0, high0)
    assert abs(float(new_low) - float(ref_low)) < 1e-4 + 1e-3 * abs(float(ref_low))
    assert abs(float(new_high) - float(ref_high)) < 1e-4 + 1e-3 * abs(float(ref_high))
    assert abs(float(inv_scale) - float(ref_scale)) < 1e-4 + 1e-3 * abs(float(ref_scale))

    print("KERNEL_OK")
</pallas_src>

<mosaic_0001>
module attributes {stable_mosaic.version = 11 : i64} {
  func.func @_moments_kernel(%arg0: memref<2xf32, #tpu.memory_space<smem>>, %arg1: memref<16x128xi32, #tpu.memory_space<vmem>>, %arg2: memref<1x128xf32, #tpu.memory_space<vmem>>) attributes {dimension_semantics = [], scalar_prefetch = 0 : i64, scratch_operands = 0 : i64, tpu.core_type = #tpu.core_type<tc>} {
    %c-2147483648_i32 = arith.constant -2147483648 : i32
    %0 = vector.broadcast %c-2147483648_i32 : i32 to vector<1x1xi32>
    %c2147483647_i32 = arith.constant 2147483647 : i32
    %1 = vector.broadcast %c2147483647_i32 : i32 to vector<1x1xi32>
    %c103_i32 = arith.constant 103 : i32
    %c1945_i32 = arith.constant 1945 : i32
    %c0_i32 = arith.constant 0 : i32
    %c32_i32 = arith.constant 32 : i32
    %2 = arith.addi %c0_i32, %c32_i32 : i32
    %c1_i32 = arith.constant 1 : i32
    %3:4 = scf.for %arg3 = %c0_i32 to %2 step %c1_i32 iter_args(%arg4 = %0, %arg5 = %1, %arg6 = %0, %arg7 = %1) -> (vector<1x1xi32>, vector<1x1xi32>, vector<1x1xi32>, vector<1x1xi32>)  : i32 {
      %c1_i32_35 = arith.constant 1 : i32
      %114 = vector.broadcast %c1_i32_35 : i32 to vector<1x1xi32>
      %115 = arith.shrsi %arg4, %114 : vector<1x1xi32>
      %c1_i32_36 = arith.constant 1 : i32
      %116 = vector.broadcast %c1_i32_36 : i32 to vector<1x1xi32>
      %117 = arith.shrsi %arg5, %116 : vector<1x1xi32>
      %118 = arith.addi %115, %117 : vector<1x1xi32>
      %119 = arith.andi %arg4, %arg5 : vector<1x1xi32>
      %c1_i32_37 = arith.constant 1 : i32
      %120 = vector.broadcast %c1_i32_37 : i32 to vector<1x1xi32>
      %121 = arith.andi %119, %120 : vector<1x1xi32>
      %122 = arith.addi %118, %121 : vector<1x1xi32>
      %c1_i32_38 = arith.constant 1 : i32
      %123 = vector.broadcast %c1_i32_38 : i32 to vector<1x1xi32>
      %124 = arith.shrsi %arg6, %123 : vector<1x1xi32>
      %c1_i32_39 = arith.constant 1 : i32
      %125 = vector.broadcast %c1_i32_39 : i32 to vector<1x1xi32>
      %126 = arith.shrsi %arg7, %125 : vector<1x1xi32>
      %127 = arith.addi %124, %126 : vector<1x1xi32>
      %128 = arith.andi %arg6, %arg7 : vector<1x1xi32>
      %c1_i32_40 = arith.constant 1 : i32
      %129 = vector.broadcast %c1_i32_40 : i32 to vector<1x1xi32>
      %130 = arith.andi %128, %129 : vector<1x1xi32>
      %131 = arith.addi %127, %130 : vector<1x1xi32>
      %c0_i32_41 = arith.constant 0 : i32
      %132 = vector.broadcast %c0_i32_41 : i32 to vector<1x128xi32>
      %c0_42 = arith.constant 0 : index
      %c0_43 = arith.constant 0 : index
      %133 = vector.load %arg1[%c0_42, %c0_43] : memref<16x128xi32, #tpu.memory_space<vmem>>, vector<16x128xi32>
      %134 = vector.broadcast %122 : vector<1x1xi32> to vector<16x128xi32>
      %135 = arith.cmpi sle, %133, %134 : vector<16x128xi32>
      %136 = arith.extui %135 : vector<16x128xi1> to vector<16x128xi32>
      %cst_44 = arith.constant dense<0> : vector<128xi32>
      %137 = vector.multi_reduction <add>, %136, %cst_44 [0] : vector<16x128xi32> to vector<128xi32>
      %138 = vector.shape_cast %137 : vector<128xi32> to vector<1x128xi32>
      %139 = arith.addi %132, %138 : vector<1x128xi32>
      %140 = vector.broadcast %131 : vector<1x1xi32> to vector<16x128xi32>
      %141 = arith.cmpi sle, %133, %140 : vector<16x128xi32>
      %142 = arith.extui %141 : vector<16x128xi1> to vector<16x128xi32>
      %cst_45 = arith.constant dense<0> : vector<128xi32>
      %143 = vector.multi_reduction <add>, %142, %cst_45 [0] : vector<16x128xi32> to vector<128xi32>
      %144 = vector.shape_cast %143 : vector<128xi32> to vector<1x128xi32>
      %145 = arith.addi %132, %144 : vector<1x128xi32>
      %cst_46 = arith.constant dense<0> : vector<1xi32>
      %146 = vector.multi_reduction <add>, %139, %cst_46 [1] : vector<1x128xi32> to vector<1xi32>
      %147 = vector.shape_cast %146 : vector<1xi32> to vector<1x1xi32>
      %cst_47 = arith.constant dense<0> : vector<1xi32>
      %148 = vector.multi_reduction <add>, %145, %cst_47 [1] : vector<1x128xi32> to vector<1xi32>
      %149 = vector.shape_cast %148 : vector<1xi32> to vector<1x1xi32>
      %150 = vector.broadcast %c103_i32 : i32 to vector<1x1xi32>
      %151 = arith.cmpi sge, %147, %150 : vector<1x1xi32>
      %152 = vector.broadcast %c1945_i32 : i32 to vector<1x1xi32>
      %153 = arith.cmpi sge, %149, %152 : vector<1x1xi32>
      %c1_i32_48 = arith.constant 1 : i32
      %154 = vector.broadcast %c1_i32_48 : i32 to vector<1x1xi32>
      %155 = arith.addi %122, %154 : vector<1x1xi32>
      %156 = arith.select %151, %arg4, %155 : vector<1x1xi1>, vector<1x1xi32>
      %157 = arith.select %151, %122, %arg5 : vector<1x1xi1>, vector<1x1xi32>
      %c1_i32_49 = arith.constant 1 : i32
      %158 = vector.broadcast %c1_i32_49 : i32 to vector<1x1xi32>
      %159 = arith.addi %131, %158 : vector<1x1xi32>
      %160 = arith.select %153, %arg6, %159 : vector<1x1xi1>, vector<1x1xi32>
      %161 = arith.select %153, %131, %arg7 : vector<1x1xi1>, vector<1x1xi32>
      scf.yield %156, %157, %160, %161 : vector<1x1xi32>, vector<1x1xi32>, vector<1x1xi32>, vector<1x1xi32>
    }
    %c31_i32 = arith.constant 31 : i32
    %4 = vector.broadcast %c31_i32 : i32 to vector<1x1xi32>
    %5 = arith.shrsi %3#1, %4 : vector<1x1xi32>
    %c2147483647_i32_0 = arith.constant 2147483647 : i32
    %6 = vector.broadcast %c2147483647_i32_0 : i32 to vector<1x1xi32>
    %7 = arith.andi %5, %6 : vector<1x1xi32>
    %8 = arith.xori %3#1, %7 : vector<1x1xi32>
    %9 = tpu.bitcast %8 : vector<1x1xi32> -> vector<1x1xf32>
    %c31_i32_1 = arith.constant 31 : i32
    %10 = vector.broadcast %c31_i32_1 : i32 to vector<1x1xi32>
    %11 = arith.shrsi %3#3, %10 : vector<1x1xi32>
    %c2147483647_i32_2 = arith.constant 2147483647 : i32
    %12 = vector.broadcast %c2147483647_i32_2 : i32 to vector<1x1xi32>
    %13 = arith.andi %11, %12 : vector<1x1xi32>
    %14 = arith.xori %3#3, %13 : vector<1x1xi32>
    %15 = tpu.bitcast %14 : vector<1x1xi32> -> vector<1x1xf32>
    %c0_i32_3 = arith.constant 0 : i32
    %16 = vector.broadcast %c0_i32_3 : i32 to vector<1x128xi32>
    %c2147483647_i32_4 = arith.constant 2147483647 : i32
    %17 = vector.broadcast %c2147483647_i32_4 : i32 to vector<1x128xi32>
    %c0 = arith.constant 0 : index
    %c0_5 = arith.constant 0 : index
    %18 = vector.load %arg1[%c0, %c0_5] : memref<16x128xi32, #tpu.memory_space<vmem>>, vector<16x128xi32>
    %19 = vector.broadcast %3#1 : vector<1x1xi32> to vector<16x128xi32>
    %20 = arith.cmpi sle, %18, %19 : vector<16x128xi32>
    %21 = arith.extui %20 : vector<16x128xi1> to vector<16x128xi32>
    %cst = arith.constant dense<0> : vector<128xi32>
    %22 = vector.multi_reduction <add>, %21, %cst [0] : vector<16x128xi32> to vector<128xi32>
    %23 = vector.shape_cast %22 : vector<128xi32> to vector<1x128xi32>
    %24 = arith.addi %16, %23 : vector<1x128xi32>
    %25 = vector.broadcast %3#3 : vector<1x1xi32> to vector<16x128xi32>
    %26 = arith.cmpi sle, %18, %25 : vector<16x128xi32>
    %27 = arith.extui %26 : vector<16x128xi1> to vector<16x128xi32>
    %cst_6 = arith.constant dense<0> : vector<128xi32>
    %28 = vector.multi_reduction <add>, %27, %cst_6 [0] : vector<16x128xi32> to vector<128xi32>
    %29 = vector.shape_cast %28 : vector<128xi32> to vector<1x128xi32>
    %30 = arith.addi %16, %29 : vector<1x128xi32>
    %31 = vector.broadcast %3#1 : vector<1x1xi32> to vector<16x128xi32>
    %32 = arith.cmpi sgt, %18, %31 : vector<16x128xi32>
    %c2147483647_i32_7 = arith.constant 2147483647 : i32
    %33 = vector.broadcast %c2147483647_i32_7 : i32 to vector<16x128xi32>
    %34 = arith.select %32, %18, %33 : vector<16x128xi1>, vector<16x128xi32>
    %cst_8 = arith.constant dense<2147483647> : vector<128xi32>
    %35 = vector.multi_reduction <minsi>, %34, %cst_8 [0] : vector<16x128xi32> to vector<128xi32>
    %36 = vector.shape_cast %35 : vector<128xi32> to vector<1x128xi32>
    %37 = arith.minsi %17, %36 : vector<1x128xi32>
    %38 = vector.broadcast %3#3 : vector<1x1xi32> to vector<16x128xi32>
    %39 = arith.cmpi sgt, %18, %38 : vector<16x128xi32>
    %c2147483647_i32_9 = arith.constant 2147483647 : i32
    %40 = vector.broadcast %c2147483647_i32_9 : i32 to vector<16x128xi32>
    %41 = arith.select %39, %18, %40 : vector<16x128xi1>, vector<16x128xi32>
    %cst_10 = arith.constant dense<2147483647> : vector<128xi32>
    %42 = vector.multi_reduction <minsi>, %41, %cst_10 [0] : vector<16x128xi32> to vector<128xi32>
    %43 = vector.shape_cast %42 : vector<128xi32> to vector<1x128xi32>
    %44 = arith.minsi %17, %43 : vector<1x128xi32>
    %cst_11 = arith.constant dense<0> : vector<1xi32>
    %45 = vector.multi_reduction <add>, %24, %cst_11 [1] : vector<1x128xi32> to vector<1xi32>
    %46 = vector.shape_cast %45 : vector<1xi32> to vector<1x1xi32>
    %cst_12 = arith.constant dense<0> : vector<1xi32>
    %47 = vector.multi_reduction <add>, %30, %cst_12 [1] : vector<1x128xi32> to vector<1xi32>
    %48 = vector.shape_cast %47 : vector<1xi32> to vector<1x1xi32>
    %cst_13 = arith.constant dense<2147483647> : vector<1xi32>
    %49 = vector.multi_reduction <minsi>, %37, %cst_13 [1] : vector<1x128xi32> to vector<1xi32>
    %50 = vector.shape_cast %49 : vector<1xi32> to vector<1x1xi32>
    %cst_14 = arith.constant dense<2147483647> : vector<1xi32>
    %51 = vector.multi_reduction <minsi>, %44, %cst_14 [1] : vector<1x128xi32> to vector<1xi32>
    %52 = vector.shape_cast %51 : vector<1xi32> to vector<1x1xi32>
    %c103_i32_15 = arith.constant 103 : i32
    %c1_i32_16 = arith.constant 1 : i32
    %53 = arith.addi %c103_i32_15, %c1_i32_16 : i32
    %54 = vector.broadcast %53 : i32 to vector<1x1xi32>
    %55 = arith.cmpi sge, %46, %54 : vector<1x1xi32>
    %56 = arith.cmpi eq, %50, %1 : vector<1x1xi32>
    %57 = arith.select %56, %3#1, %50 : vector<1x1xi1>, vector<1x1xi32>
    %58 = arith.select %55, %3#1, %57 : vector<1x1xi1>, vector<1x1xi32>
    %c1945_i32_17 = arith.constant 1945 : i32
    %c1_i32_18 = arith.constant 1 : i32
    %59 = arith.addi %c1945_i32_17, %c1_i32_18 : i32
    %60 = vector.broadcast %59 : i32 to vector<1x1xi32>
    %61 = arith.cmpi sge, %48, %60 : vector<1x1xi32>
    %62 = arith.cmpi eq, %52, %1 : vector<1x1xi32>
    %63 = arith.select %62, %3#3, %52 : vector<1x1xi1>, vector<1x1xi32>
    %64 = arith.select %61, %3#3, %63 : vector<1x1xi1>, vector<1x1xi32>
    %c31_i32_19 = arith.constant 31 : i32
    %65 = vector.broadcast %c31_i32_19 : i32 to vector<1x1xi32>
    %66 = arith.shrsi %58, %65 : vector<1x1xi32>
    %c2147483647_i32_20 = arith.constant 2147483647 : i32
    %67 = vector.broadcast %c2147483647_i32_20 : i32 to vector<1x1xi32>
    %68 = arith.andi %66, %67 : vector<1x1xi32>
    %69 = arith.xori %58, %68 : vector<1x1xi32>
    %70 = tpu.bitcast %69 : vector<1x1xi32> -> vector<1x1xf32>
    %c31_i32_21 = arith.constant 31 : i32
    %71 = vector.broadcast %c31_i32_21 : i32 to vector<1x1xi32>
    %72 = arith.shrsi %64, %71 : vector<1x1xi32>
    %c2147483647_i32_22 = arith.constant 2147483647 : i32
    %73 = vector.broadcast %c2147483647_i32_22 : i32 to vector<1x1xi32>
    %74 = arith.andi %72, %73 : vector<1x1xi32>
    %75 = arith.xori %64, %74 : vector<1x1xi32>
    %76 = tpu.bitcast %75 : vector<1x1xi32> -> vector<1x1xf32>
    %77 = arith.subf %70, %9 : vector<1x1xf32>
    %cst_23 = arith.constant 3.500000e-01 : f32
    %78 = vector.broadcast %cst_23 : f32 to vector<1x1xf32>
    %79 = arith.mulf %78, %77 : vector<1x1xf32>
    %80 = arith.addf %9, %79 : vector<1x1xf32>
    %81 = arith.subf %76, %15 : vector<1x1xf32>
    %cst_24 = arith.constant 6.500000e-01 : f32
    %82 = vector.broadcast %cst_24 : f32 to vector<1x1xf32>
    %83 = arith.mulf %82, %81 : vector<1x1xf32>
    %84 = arith.addf %15, %83 : vector<1x1xf32>
    %c0_25 = arith.constant 0 : index
    %85 = memref.load %arg0[%c0_25] : memref<2xf32, #tpu.memory_space<smem>>
    %c1 = arith.constant 1 : index
    %86 = memref.load %arg0[%c1] : memref<2xf32, #tpu.memory_space<smem>>
    %cst_26 = arith.constant 9.900000e-01 : f32
    %87 = arith.mulf %cst_26, %85 : f32
    %cst_27 = arith.constant 0.00999999977 : f32
    %88 = vector.broadcast %cst_27 : f32 to vector<1x1xf32>
    %89 = arith.mulf %88, %80 : vector<1x1xf32>
    %90 = vector.broadcast %87 : f32 to vector<1x1xf32>
    %91 = arith.addf %90, %89 : vector<1x1xf32>
    %cst_28 = arith.constant 9.900000e-01 : f32
    %92 = arith.mulf %cst_28, %86 : f32
    %cst_29 = arith.constant 0.00999999977 : f32
    %93 = vector.broadcast %cst_29 : f32 to vector<1x1xf32>
    %94 = arith.mulf %93, %84 : vector<1x1xf32>
    %95 = vector.broadcast %92 : f32 to vector<1x1xf32>
    %96 = arith.addf %95, %94 : vector<1x1xf32>
    %97 = arith.subf %96, %91 : vector<1x1xf32>
    %cst_30 = arith.constant 1.000000e+00 : f32
    %98 = vector.broadcast %cst_30 : f32 to vector<1x1xf32>
    %99 = arith.maximumf %98, %97 : vector<1x1xf32>
    %100 = tpu.iota {dimensions = array<i32: 1>} : vector<1x128xi32>
    %c0_i32_31 = arith.constant 0 : i32
    %101 = vector.broadcast %c0_i32_31 : i32 to vector<1x128xi32>
    %102 = arith.cmpi eq, %100, %101 : vector<1x128xi32>
    %c1_i32_32 = arith.constant 1 : i32
    %103 = vector.broadcast %c1_i32_32 : i32 to vector<1x128xi32>
    %104 = arith.cmpi eq, %100, %103 : vector<1x128xi32>
    %105 = vector.shape_cast %96 : vector<1x1xf32> to vector<1x1xf32>
    %106 = vector.broadcast %105 : vector<1x1xf32> to vector<1x128xf32>
    %107 = vector.shape_cast %99 : vector<1x1xf32> to vector<1x1xf32>
    %108 = vector.broadcast %107 : vector<1x1xf32> to vector<1x128xf32>
    %109 = arith.select %104, %106, %108 : vector<1x128xi1>, vector<1x128xf32>
    %110 = vector.shape_cast %91 : vector<1x1xf32> to vector<1x1xf32>
    %111 = vector.broadcast %110 : vector<1x1xf32> to vector<1x128xf32>
    %112 = arith.select %102, %111, %109 : vector<1x128xi1>, vector<1x128xf32>
    %c0_33 = arith.constant 0 : index
    %c0_34 = arith.constant 0 : index
    %113 = vector.load %arg2[%c0_33, %c0_34] : memref<1x128xf32, #tpu.memory_space<vmem>>, vector<1x128xf32>
    tpu.vector_store %arg2[%c0_33, %c0_34], %112 {strides = array<i32>} : memref<1x128xf32, #tpu.memory_space<vmem>>, vector<1x128xf32>,
    return
  }
}

</mosaic_0001>

<bundles_post_ra>
// kernel: tpu_custom_call.1
= control target key start
LH: loop header
LB: loop body
LE: loop exit
PB: predicated region body
PF: predicated region fallthrough
CT: control target
= control target key end

     0   :  { %7 = vsyncpa [#allocation5], 0  ;;  %s579_s0 = inlined_call_operand.hbm [shape: f32[2], index: 0, kind: input, shape index: {}]   ;;  %s580_s1 = inlined_call_operand.hbm [shape: s32[16,128], index: 1, kind: input, shape index: {}]   ;;  %s581_s2 = inlined_call_operand.hbm [shape: f32[1,128], index: 2, kind: output, shape index: {}]  }
   0x1   :  { %8 = vsyncpa [#allocation3], 0 }
   0x2   :  { %9 = vsyncpa [#allocation4], 0  ;;  %s351_s11 = scalar_lea.hbm %s579_s0, 16 }
   0x3   :  { %p352_p0 = scmp.ne.s32.totalorder %s579_s0, %s351_s11  ;;  %p355_p1 = scmp.lt.u32.totalorder %s351_s11, %s579_s0 }
   0x5   :  { %p357_p2 = pnand %p355_p1, %p352_p0 }
   0x7   :  { %360 = shalt.err (!%p357_p2)
}
   0x8   :  { %s451_s16 = smov [#allocation2]   ;;  %s452_s19 = smov [#allocation6]  }
   0x9   :  { %17 = dma.hbm_to_smem %s579_s0, 16, %s451_s16, [#allocation5]  }
   0xa   :  { %s23_s20 = sshll.u32 %s452_s19, 4  ;;  %s361_s23 = scalar_lea.hbm %s580_s1, 256  ;;  %s24_s20 = int_to_ptr.vmem [resolvable:$true] %s23_s20 }
   0xb   :  { %p362_p3 = scmp.ne.s32.totalorder %s580_s1, %s361_s23  ;;  %p365_p4 = scmp.lt.u32.totalorder %s361_s23, %s580_s1 }
   0xd   :  { %p367_p5 = pnand %p365_p4, %p362_p3 }
   0xf   :  { %370 = shalt.err (!%p367_p5)
}
  0x10   :  { %s371_s28 = scalar_lea.vmem %s24_s20, 256  ;;  %p376_p7 = scmp.lt.s32.totalorder %s24_s20, %s24_s20 }
  0x11   :  { %p372_p6 = scmp.ne.s32.totalorder %s24_s20, %s371_s28  ;;  %p377_p8 = scmp.lt.s32.totalorder %s371_s28, %s371_s28 }
  0x13   :  { %p378_p9 = por %p377_p8, %p376_p7 }
  0x15   :  { %p379_p10 = pnand %p378_p9, %p372_p6 }
  0x17   :  { %382 = shalt.err (!%p379_p10)
}
  0x18   :  { %s453_s0 = smov 128   ;;  %s454_s29 = smov 8  }
  0x19   :  { %29 = dma.hbm_to_vmem [thread:$0]  %s580_s1, 256, %s24_s20, [#allocation3], %s453_s0, %s453_s0, %s454_s29  }
  0x1a   :  { %425 = dma.done.wait [#allocation5], 16  }
  0x1b   :  { %426 = vsyncadd [#allocation5], 4294967280 }
  0x1c   :  { %427 = dma.done.wait [#allocation3], 256  }
  0x1d   :  { %428 = vsyncadd [#allocation3], 4294967040 }
  0x1e   :  { %36 = sfence }
  0x1f   :  { %v497_v0 = vmov 2147483647   ;;  %v499_v1 = vmov 2147483648   ;;  %v501_v2 = vmov 2147483647   ;;  %v503_v3 = vmov 2147483648  }
  0x20   :  { %s505_s4 = smov 0  }
  0x21 LB: > { %v47_v4 = vshra.s32 %v445_v3, 1  ;;  %v48_v5 = vshra.s32 %v441_v2, 1  ;;  %v50_v6 = vand.u32 %v441_v2, %v445_v3  ;;  %v53_v7 = vshra.s32 %v437_v1, 1  ;;  %v59_v12 = vld [vmem:[#allocation6] sm:$0xff]  ;;  %v60_v13 = vld [vmem:[#allocation6 + $0x8] sm:$0xff]  ;;  %s42_s4 = sadd.s32 1, %s449_s4   ;;  %s449_s4 = sphi %s505_s4, %s42_s4   ;;  %v445_v3 = vphi %v503_v3, %v110_v3   ;;  %v441_v2 = vphi %v501_v2, %v585_v2   ;;  %v437_v1 = vphi %v499_v1, %v113_v1   ;;  %v433_v0 = vphi %v497_v0, %v584_v0  }
  0x22   : > { %v54_v8 = vshra.s32 %v433_v0, 1  ;;  %v56_v9 = vand.u32 %v433_v0, %v437_v1  ;;  %v455_v18 = vmov 0   ;;  %p39_p11 = scmp.ge.s32.totalorder %s42_s4, 32  }
  0x23   : > { %v49_v10 = vadd.s32 %v48_v5, %v47_v4  ;;  %v51_v11 = vand.u32 1, %v50_v6  ;;  %v123_v61 = vld [vmem:[#allocation6] sm:$0xff] (%p39_p11)  ;;  %v124_v62 = vld [vmem:[#allocation6 + $0x8] sm:$0xff] (%p39_p11)  ;;  %v456_v6 = vmov (%p39_p11), 0   ;;  %s251_s1 = sld [smem:[#allocation2]] (%p39_p11)  ;;  %s303_s5 = sld [smem:[#allocation2 + $0x1]] (%p39_p11) }
  0x24   : > { %v55_v14 = vadd.s32 %v54_v8, %v53_v7  ;;  %v57_v15 = vand.u32 1, %v56_v9  ;;  %s457_s8 = smov (%p39_p11), [#allocation7]  }
  0x25   : > { %v52_v16 = vadd.s32 %v51_v11, %v49_v10  ;;  %s276_s9 = sshll.u32 (%p39_p11), %s457_s8, 4  ;;  %s277_s9 = int_to_ptr.vmem [resolvable:$true] %s276_s9 }
  0x26   : > { %v58_v17 = vadd.s32 %v57_v15, %v55_v14  ;;  %s383_s10 = scalar_lea.vmem (%p39_p11), %s277_s9, 16  ;;  %s387_s11 = scalar_lea.vmem (%p39_p11), %s277_s9, 32 }
  0x27   : > { %vm61_vm0 = vcmp.le.s32.totalorder %v59_v12, %v52_v16  ;;  %vm62_vm1 = vcmp.le.s32.totalorder %v60_v13, %v52_v16  ;;  %v109_v50 = vadd.s32 1, %v52_v16  ;;  %p384_p12 = scmp.ne.s32.totalorder (%p39_p11), %s277_s9, %s383_s10  ;;  %p388_p13 = scmp.lt.s32.totalorder (%p39_p11), %s277_s9, %s277_s9 }
  0x28   : > { %v63_v19 = vsel %vm61_vm0, 1, %v455_v18  ;;  %v64_v20 = vsel %vm62_vm1, 1, %v455_v18  ;;  %vm72_vm2 = vcmp.le.s32.totalorder %v59_v12, %v58_v17  ;;  %vm73_vm3 = vcmp.le.s32.totalorder %v60_v13, %v58_v17  ;;  %p389_p0 = scmp.lt.s32.totalorder (%p39_p11), %s387_s11, %s383_s10 }
  0x29   : > { %v65_v21 = vadd.s32 %v64_v20, %v63_v19  ;;  %v74_v22 = vsel %vm72_vm2, 1, %v455_v18  ;;  %v75_v23 = vsel %vm73_vm3, 1, %v455_v18  ;;  %v112_v58 = vadd.s32 1, %v58_v17  ;;  %s253_s6 = smul.f32 (%p39_p11), 0.99, %s251_s1 }
  0x2a   : > { %v76_v24 = vadd.s32 %v75_v23, %v74_v22  ;;  %s257_s7 = smul.f32 (%p39_p11), 0.99, %s303_s5  ;;  %p390_p1 = por (%p39_p11), %p389_p0, %p388_p13 }
  0x2b   : > { %v66_v25 = vrot.slane %v65_v21, 4 }
  0x2c   : > { %v77_v26 = vrot.slane %v76_v24, 4  ;;  %p391_p2 = pnand (%p39_p11), %p390_p1, %p384_p12 }
  0x2d   : > { %v67_v27 = vadd.s32 %v66_v25, %v65_v21 }
  0x2e   : > { %v78_v28 = vadd.s32 %v77_v26, %v76_v24 }
  0x2f   : > { %v68_v29 = vrot.slane %v67_v27, 2 }
  0x30   : > { %v79_v30 = vrot.slane %v78_v28, 2 }
  0x31   : > { %v69_v31 = vadd.s32 %v68_v29, %v67_v27 }
  0x32   : > { %v80_v32 = vadd.s32 %v79_v30, %v78_v28 }
  0x33   : > { %v70_v33 = vrot.slane %v69_v31, 1 }
  0x34   : > { %v81_v34 = vrot.slane %v80_v32, 1 }
  0x35   : > { %v71_v35 = vadd.s32 %v70_v33, %v69_v31 }
  0x36   : > { %v82_v36 = vadd.s32 %v81_v34, %v80_v32 }
  0x37   : > { %v84_v37 = vshrl.u32 %v71_v35, 16  ;;  %v83_v38 = vand.u32 65535, %v71_v35 }
  0x38   : > { %v96_v39 = vshrl.u32 %v82_v36, 16  ;;  %v95_v40 = vand.u32 65535, %v82_v36 }
  0x39   : > { %v86_v41 = vcvt.s32.f32 %v84_v37  ;;  %v85_v42 = vcvt.s32.f32 %v83_v38 }
  0x3a   : > { %v98_v43 = vcvt.s32.f32 %v96_v39  ;;  %v97_v44 = vcvt.s32.f32 %v95_v40 }
  0x3b   : > { %89 = vadd.xlane.f32.xlu0 %v86_v41  ;;  %87 = vadd.xlane.f32.xlu1 %v85_v42 }
  0x3f   : > { %101 = vadd.xlane.f32.xlu0 %v98_v43  ;;  %99 = vadd.xlane.f32.xlu1 %v97_v44 }
  0xc8   : > { %v90_v45 = vpop.xlane.xlu0 %89  ;;  %v88_v46 = vpop.xlane.xlu1 %87 }
  0xc9   : > { %v92_v47 = vcvt.f32.s32 %v90_v45  ;;  %v91_v48 = vcvt.f32.s32 %v88_v46 }
  0xcb   : > { %v93_v49 = vshll.u32 %v92_v47, 16 }
  0xcc   : > { %v102_v51 = vpop.xlane.xlu0 %101  ;;  %v100_v52 = vpop.xlane.xlu1 %99 }
  0xcd   : > { %v94_v53 = vadd.s32 %v93_v49, %v91_v48  ;;  %v104_v54 = vcvt.f32.s32 %v102_v51  ;;  %v103_v55 = vcvt.f32.s32 %v100_v52 }
  0xcf   : > { %vm107_vm4 = vcmp.ge.s32.totalorder %v94_v53, 103  ;;  %v105_v56 = vshll.u32 %v104_v54, 16 }
  0xd0   : > { %v110_v3 = vsel %vm107_vm4, %v445_v3, %v109_v50   ;;  %v532_v2 = vsel %vm107_vm4, %v52_v16, %v441_v2   ;;  %41 = sbr.rel (!%p39_p11) target bundleno = 33 (0x21), region = 43 }
  0xd1   : > { %v582_v57 = vmov %v532_v2  ;;  %v106_v59 = vadd.s32 %v105_v56, %v103_v55 }
  0xd2   : > { %v585_v2 = vmov %v582_v57  ;;  %vm147_vm6 = vcmp.gt.s32.totalorder (%p39_p11), %v123_v61, %v582_v57  ;;  %vm148_vm7 = vcmp.gt.s32.totalorder (%p39_p11), %v124_v62, %v582_v57  ;;  %vm125_vm10 = vcmp.le.s32.totalorder (%p39_p11), %v123_v61, %v582_v57 }
  0xd3   : > { %vm108_vm5 = vcmp.ge.s32.totalorder %v106_v59, 1945  ;;  %v149_v63 = vsel (%p39_p11), %vm147_vm6, %v123_v61, 2147483647  ;;  %v150_v4 = vsel (%p39_p11), %vm148_vm7, %v124_v62, 2147483647  ;;  %vm126_vm12 = vcmp.le.s32.totalorder (%p39_p11), %v124_v62, %v582_v57 }
  0xd4   : > { %v113_v1 = vsel %vm108_vm5, %v437_v1, %v112_v58   ;;  %v536_v0 = vsel %vm108_vm5, %v58_v17, %v433_v0   ;;  %vm151_vm11 = vcmp.lt.s32.totalorder (%p39_p11), %v149_v63, %v150_v4  ;;  %v128_v2 = vsel (%p39_p11), %vm126_vm12, 1, %v456_v6 }
  0xd5   : > { %v583_v60 = vmov %v536_v0  ;;  %v152_v1 = vsel (%p39_p11), %vm151_vm11, %v149_v63, %v150_v4 }
  0xd6   : > { %v584_v0 = vmov %v583_v60  ;;  %vm162_vm8 = vcmp.gt.s32.totalorder (%p39_p11), %v123_v61, %v583_v60  ;;  %vm163_vm9 = vcmp.gt.s32.totalorder (%p39_p11), %v124_v62, %v583_v60  ;;  %v153_v7 = vrot.slane (%p39_p11), %v152_v1, 4 }
  0xd7   :  { %v164_v5 = vsel %vm162_vm8, %v123_v61, 2147483647  ;;  %v165_v3 = vsel %vm163_vm9, %v124_v62, 2147483647  ;;  %v127_v0 = vsel %vm125_vm10, 1, %v456_v6  ;;  %vm136_vm4 = vcmp.le.s32.totalorder %v123_v61, %v583_v60 }
  0xd8   :  { %vm166_vm13 = vcmp.lt.s32.totalorder %v164_v5, %v165_v3  ;;  %v129_v9 = vadd.s32 %v128_v2, %v127_v0  ;;  %vm154_vm14 = vcmp.lt.s32.totalorder %v152_v1, %v153_v7  ;;  %vm137_vm5 = vcmp.le.s32.totalorder %v124_v62, %v583_v60 }
  0xd9   :  { %v167_v8 = vsel %vm166_vm13, %v164_v5, %v165_v3  ;;  %v155_v12 = vsel %vm154_vm14, %v152_v1, %v153_v7  ;;  %v138_v29 = vsel %vm136_vm4, 1, %v456_v6  ;;  %v139_v32 = vsel %vm137_vm5, 1, %v456_v6 }
  0xda   :  { %v168_v10 = vrot.slane %v167_v8, 4  ;;  %v130_v11 = vrot.slane %v129_v9, 4  ;;  %v156_v13 = vrot.slane %v155_v12, 2  ;;  %v140_v33 = vadd.s32 %v139_v32, %v138_v29 }
  0xdb   :  { %v115_v2 = vshra.s32 %v582_v57, 31 }
  0xdc   :  { %vm169_vm15 = vcmp.lt.s32.totalorder %v167_v8, %v168_v10  ;;  %v131_v15 = vadd.s32 %v130_v11, %v129_v9  ;;  %vm157_vm0 = vcmp.lt.s32.totalorder %v155_v12, %v156_v13  ;;  %v141_v36 = vrot.slane %v140_v33, 4 }
  0xdd   :  { %v170_v14 = vsel %vm169_vm15, %v167_v8, %v168_v10  ;;  %v158_v18 = vsel %vm157_vm0, %v155_v12, %v156_v13 }
  0xde   :  { %v171_v16 = vrot.slane %v170_v14, 2  ;;  %v132_v17 = vrot.slane %v131_v15, 2  ;;  %v159_v19 = vrot.slane %v158_v18, 1  ;;  %v142_v37 = vadd.s32 %v141_v36, %v140_v33 }
  0xdf   :  { %v263_v36 = vlaneseq }
  0xe0   :  { %vm172_vm1 = vcmp.lt.s32.totalorder %v170_v14, %v171_v16  ;;  %v133_v21 = vadd.s32 %v132_v17, %v131_v15  ;;  %vm160_vm2 = vcmp.lt.s32.totalorder %v158_v18, %v159_v19  ;;  %v143_v38 = vrot.slane %v142_v37, 2 }
  0xe1   :  { %v173_v20 = vsel %vm172_vm1, %v170_v14, %v171_v16  ;;  %v161_v24 = vsel %vm160_vm2, %v158_v18, %v159_v19  ;;  %v116_v14 = vand.u32 2147483647, %v115_v2  ;;  %v119_v17 = vshra.s32 %v583_v60, 31 }
  0xe2   :  { %v174_v22 = vrot.slane %v173_v20, 1  ;;  %v134_v23 = vrot.slane %v133_v21, 1  ;;  %v202_v25 = vshra.s32 %v161_v24, 16  ;;  %v144_v39 = vadd.s32 %v143_v38, %v142_v37 }
  0xe3   :  { %v201_v44 = vand.u32 65535, %v161_v24 }
  0xe4   :  { %vm175_vm3 = vcmp.lt.s32.totalorder %v173_v20, %v174_v22  ;;  %v135_v27 = vadd.s32 %v134_v23, %v133_v21  ;;  %v204_v30 = vcvt.s32.f32 %v202_v25  ;;  %v145_v40 = vrot.slane %v144_v39, 1 }
  0xe5   :  { %v176_v26 = vsel %vm175_vm3, %v173_v20, %v174_v22  ;;  %v203_v45 = vcvt.s32.f32 %v201_v44  ;;  %v117_v22 = vxor.u32 %v116_v14, %v582_v57  ;;  %v120_v25 = vand.u32 2147483647, %v119_v17 }
  0xe6   :  { %v216_v28 = vshra.s32 %v176_v26, 16  ;;  %v178_v31 = vshrl.u32 %v135_v27, 16  ;;  %205 = vmin.xlane.f32.xlu0 %v204_v30  ;;  %v146_v41 = vadd.s32 %v145_v40, %v144_v39  ;;  %v215_v46 = vand.u32 65535, %v176_v26 }
  0xe7   :  { %v177_v47 = vand.u32 65535, %v135_v27  ;;  %v255_v39 = vstv %s253_s6  ;;  %v259_v40 = vstv %s257_s7 }
  0xe8   :  { %v218_v34 = vcvt.s32.f32 %v216_v28  ;;  %v180_v35 = vcvt.s32.f32 %v178_v31  ;;  %v190_v42 = vshrl.u32 %v146_v41, 16  ;;  %v217_v50 = vcvt.s32.f32 %v215_v46 }
  0xe9   :  { %v179_v51 = vcvt.s32.f32 %v177_v47  ;;  %v189_v52 = vand.u32 65535, %v146_v41 }
  0xea   :  { %183 = vadd.xlane.f32.xlu1 %v180_v35  ;;  %219 = vmin.xlane.f32.xlu0 %v218_v34  ;;  %v192_v43 = vcvt.s32.f32 %v190_v42  ;;  %v264_v42 = vand.u32 127, %v263_v36 }
  0xeb   :  { %v191_v55 = vcvt.s32.f32 %v189_v52 }
  0xec   :  { %vm266_vm12 = vcmp.eq.s32.totalorder %v264_v42, 1  ;;  %vm265_vm13 = vcmp.eq.s32.totalorder %v264_v42, 0 }
  0xee   :  { %195 = vadd.xlane.f32.xlu1 %v192_v43 }
 0x173   :  { %v206_v48 = vpop.xlane.xlu0 %205 }
 0x174   :  { %vm207_vm6 = vcmp.eq.f32.partialorder %v204_v30, %v206_v48  ;;  %v212_v58 = vcvt.f32.s32 %v206_v48  ;;  %v121_v30 = vxor.u32 %v120_v25, %v583_v60 }
 0x175   :  { %v208_v49 = vsel %vm207_vm6, %v203_v45, inf }
 0x176   :  { %209 = vmin.xlane.f32.xlu0 %v208_v49  ;;  %v213_v62 = vshll.u32 %v212_v58, 16 }
 0x177   :  { %v220_v53 = vpop.xlane.xlu0 %219  ;;  %v184_v56 = vpop.xlane.xlu1 %183 }
 0x178   :  { %vm221_vm7 = vcmp.eq.f32.partialorder %v218_v34, %v220_v53  ;;  %v226_v63 = vcvt.f32.s32 %v220_v53  ;;  %v186_v4 = vcvt.f32.s32 %v184_v56 }
 0x179   :  { %v222_v54 = vsel %vm221_vm7, %v217_v50, inf }
 0x17a   :  { %223 = vmin.xlane.f32.xlu1 %v222_v54  ;;  %181 = vadd.xlane.f32.xlu0 %v179_v51  ;;  %v227_v7 = vshll.u32 %v226_v63, 16  ;;  %v187_v8 = vshll.u32 %v186_v4, 16 }
 0x17b   :  { %v196_v59 = vpop.xlane.xlu1 %195 }
 0x17c   :  { %v198_v6 = vcvt.f32.s32 %v196_v59 }
 0x17e   :  { %193 = vadd.xlane.f32.xlu1 %v191_v55  ;;  %v199_v13 = vshll.u32 %v198_v6, 16 }
 0x203   :  { %v210_v61 = vpop.xlane.xlu0 %209 }
 0x204   :  { %v211_v5 = vcvt.f32.s32 %v210_v61 }
 0x206   :  { %v214_v3 = vadd.s32 %v213_v62, %v211_v5 }
 0x207   :  { %v224_v0 = vpop.xlane.xlu1 %223  ;;  %v182_v1 = vpop.xlane.xlu0 %181 }
 0x208   :  { %v225_v9 = vcvt.f32.s32 %v224_v0  ;;  %v185_v10 = vcvt.f32.s32 %v182_v1  ;;  %vm230_vm8 = vcmp.eq.s32.totalorder %v214_v3, 2147483647 }
 0x209   :  { %v231_v16 = vsel %vm230_vm8, %v582_v57, %v214_v3 }
 0x20a   :  { %v228_v11 = vadd.s32 %v227_v7, %v225_v9  ;;  %v188_v12 = vadd.s32 %v187_v8, %v185_v10 }
 0x20b   :  { %v194_v15 = vpop.xlane.xlu1 %193 }
 0x20c   :  { %vm229_vm9 = vcmp.ge.s32.totalorder %v188_v12, 104  ;;  %v197_v18 = vcvt.f32.s32 %v194_v15  ;;  %vm234_vm10 = vcmp.eq.s32.totalorder %v228_v11, 2147483647 }
 0x20d   :  { %v232_v19 = vsel %vm229_vm9, %v582_v57, %v231_v16  ;;  %v235_v24 = vsel %vm234_vm10, %v583_v60, %v228_v11 }
 0x20e   :  { %v237_v20 = vshra.s32 %v232_v19, 31  ;;  %v200_v21 = vadd.s32 %v199_v13, %v197_v18 }
 0x210   :  { %v238_v23 = vand.u32 2147483647, %v237_v20  ;;  %vm233_vm11 = vcmp.ge.s32.totalorder %v200_v21, 1946 }
 0x211   :  { %v236_v26 = vsel %vm233_vm11, %v583_v60, %v235_v24 }
 0x212   :  { %v239_v27 = vxor.u32 %v238_v23, %v232_v19  ;;  %v241_v28 = vshra.s32 %v236_v26, 31 }
 0x214   :  { %v245_v29 = vsub.f32 %v239_v27, %v117_v22  ;;  %v242_v31 = vand.u32 2147483647, %v241_v28 }
 0x216   :  { %v246_v32 = vmul.f32 0.35, %v245_v29  ;;  %v243_v33 = vxor.u32 %v242_v31, %v236_v26 }
 0x218   :  { %v248_v34 = vsub.f32 %v243_v33, %v121_v30  ;;  %v247_v35 = vadd.f32 %v246_v32, %v117_v22 }
 0x21a   :  { %v249_v57 = vmul.f32 0.65, %v248_v34  ;;  %v254_v38 = vmul.f32 0.01, %v247_v35 }
 0x21c   :  { %v250_v37 = vadd.f32 %v249_v57, %v121_v30  ;;  %v256_v43 = vadd.f32 %v255_v39, %v254_v38 }
 0x21e   :  { %v258_v41 = vmul.f32 0.01, %v250_v37 }
 0x220   :  { %v260_v44 = vadd.f32 %v259_v40, %v258_v41 }
 0x222   :  { %v261_v45 = vsub.f32 %v260_v44, %v256_v43 }
 0x224   :  { %v262_v60 = vmax.f32 %v261_v45, 1.0 }
 0x226   :  { %v267_v46 = vsel %vm266_vm12, %v260_v44, %v262_v60 }
 0x227   :  { %v268_v47 = vsel %vm265_vm13, %v256_v43, %v267_v46 }
 0x228   :  { %269 = vst [vmem:[#allocation7] sm:$0x1] %v268_v47 }
 0x229   :  { %394 = shalt.err (!%p391_p2)
}
 0x22a   :  { %s395_s14 = scalar_lea.hbm %s581_s2, 16 }
 0x22b   :  { %p396_p3 = scmp.ne.s32.totalorder %s581_s2, %s395_s14  ;;  %p399_p4 = scmp.lt.u32.totalorder %s395_s14, %s581_s2 }
 0x22d   :  { %p401_p5 = pnand %p399_p4, %p396_p3 }
 0x22f   :  { %404 = shalt.err (!%p401_p5)
}
 0x230   :  { %279 = dma.vmem_to_hbm [thread:$0]  %s277_s9, 16, %s581_s2, [#allocation4]  }
 0x231   :  { %429 = dma.done.wait [#allocation4], 16  }
 0x232   :  { %430 = vsyncadd [#allocation4], 4294967280 }
 0x233   :  { %283 = vsyncpa [#allocation3], 1 }
 0x234   :  { %284 = vsyncpa [#allocation4], 1 }
 0x235   :  { %285 = vsyncpa [#allocation5], 1 }

</bundles_post_ra>
